<compile_context>
chip_gen: v6e
topology: v6e:2x2x1
jax: 0.10.0
libtpu: 0.0.40
codegen_flags: <defaults>
</compile_context>

<pallas_src>
import functools

import jax
import jax.numpy as jnp
from jax import lax
from jax.experimental import pallas as pl
from jax.experimental.pallas import tpu as pltpu


def _fast_recip(x):
    """EUP approximate reciprocal + one Newton refinement (near-f32 accurate)."""
    r = pl.reciprocal(x, approx=True)
    return r * (2.0 - x * r)


# --------------------------------------------------------------------------------------
# Single-pass kernel: normalize, score, both softmaxes (local stats for the cross-N one),
# top-2 gather, losses, read, and the memory-update partial -- all per (b, t-chunk) tile.
# Everything with an M-sized axis is kept transposed: (M, rows), rows on lanes.
# --------------------------------------------------------------------------------------
def _memory_kernel(k_ref, q_ref,
                   uq_ref, sq_ref, sm_ref, st_ref, qu_ref, cp_ref, sp_ref):
    _, C, Tt, D = q_ref.shape
    M = k_ref.shape[0]
    rows = C * Tt

    # F.normalize(query, dim=1, eps=1e-12)  ==  x * rsqrt(max(sum_c x^2, 1e-24))
    q4 = q_ref[...]                                                   # (1, C, Tt, D)
    ssq = jnp.sum(q4 * q4, axis=1, keepdims=True)
    qn4 = q4 * lax.rsqrt(jnp.maximum(ssq, 1e-24))
    qr = qn4.reshape(rows, D)                                         # (rows, D)

    keys = k_ref[...]                                                 # (M, D)

    # score^T = keys @ qr^T  : memory slots on sublanes, queries (rows) on lanes
    score_t = lax.dot_general(keys, qr, (((1,), (1,)), ((), ())),
                              preferred_element_type=jnp.float32)     # (M, rows)

    # softmax over memory slots (original dim=1)  -> reduce over axis 0 (tiny M)
    mmax = jnp.max(score_t, axis=0, keepdims=True)                    # (1, rows)
    em = jnp.exp(score_t - mmax)
    msum = jnp.sum(em, axis=0, keepdims=True)
    sm_t = em * _fast_recip(msum)                                     # (M, rows)

    # LOCAL stats for the softmax over queries (original dim=0); global combine in wrapper
    lmax = jnp.max(score_t, axis=1, keepdims=True)                    # (M, 1)
    eq = jnp.exp(score_t - lmax)                                      # (M, rows)
    lsum = jnp.sum(eq, axis=1, keepdims=True)                         # (M, 1)

    # top-2 memory slots per query (first index wins on exact ties, like torch.topk)
    ids = lax.broadcasted_iota(jnp.int32, (M, rows), 0)
    idx1 = jnp.min(jnp.where(score_t == mmax, ids, M), axis=0, keepdims=True)
    oh1 = ids == idx1
    masked = jnp.where(oh1, -jnp.inf, score_t)
    m2 = jnp.max(masked, axis=0, keepdims=True)
    idx2 = jnp.min(jnp.where(masked == m2, ids, M), axis=0, keepdims=True)
    oh1f = oh1.astype(jnp.float32)
    oh2f = (ids == idx2).astype(jnp.float32)

    # fused (., M) @ (M, D): read + top-1/top-2 key gathers in a single MXU call
    stacked = jnp.concatenate([sm_t, oh1f, oh2f], axis=1)             # (M, 3*rows)
    prod = lax.dot_general(stacked, keys, (((0,), (0,)), ((), ())),
                           preferred_element_type=jnp.float32)        # (3*rows, D)
    upd_q = prod[0:rows]                                              # (rows, D)
    pos = prod[rows:2 * rows]
    neg = prod[2 * rows:3 * rows]

    # loss partial sums (wrapper divides by N*D and N)
    dpos = qr - pos
    comp = jnp.sum(jnp.sum(dpos * dpos, axis=1, keepdims=True),
                   axis=0, keepdims=True)                             # (1, 1)
    dp = dpos + 1e-6                                                  # torch pairwise_distance eps
    dn = (qr - neg) + 1e-6
    d_pos = jnp.sqrt(jnp.sum(dp * dp, axis=1, keepdims=True))         # (rows, 1)
    d_neg = jnp.sqrt(jnp.sum(dn * dn, axis=1, keepdims=True))
    sep = jnp.sum(jnp.maximum(d_pos - d_neg + 1.0, 0.0),
                  axis=0, keepdims=True)                              # (1, 1)

    # memory-update partial: weights = onehot1 * exp(score - LOCAL colmax);
    # wrapper rescales row i by exp(lmax_i - gmax_i) and sums across tiles.
    w = oh1f * eq                                                     # (M, rows)
    qupd = lax.dot_general(w, qr, (((1,), (0,)), ((), ())),
                           preferred_element_type=jnp.float32)        # (M, D)

    uq_ref[...] = upd_q.reshape(1, C, Tt, D)
    sq_ref[...] = eq.reshape(1, 1, M, rows)          # lane-dense, transposed (raw)
    sm_ref[...] = sm_t.reshape(1, 1, M, rows)        # lane-dense, transposed
    st_ref[...] = jnp.concatenate([lmax, lsum], axis=1).reshape(1, 1, M, 2)
    qu_ref[...] = qupd.reshape(1, 1, M, D)
    cp_ref[...] = comp.reshape(1, 1, 1, 1)
    sp_ref[...] = sep.reshape(1, 1, 1, 1)


def _vmem_limit_bytes():
    """Generation-aware scoped VMEM limit (v7x: 64 MiB/TC; v5e/v6e: 128 MiB)."""
    try:
        cap = getattr(pltpu.get_tpu_info(), "vmem_capacity_bytes", None)
    except Exception:
        cap = None
    if cap is None:
        return 48 * 1024 * 1024                      # safe on every generation
    if cap >= 100 * 1024 * 1024:
        return 96 * 1024 * 1024                      # v5e / v6e
    return min(48 * 1024 * 1024, (int(cap) * 3) // 4)  # v7x


def _choose_tile_t(C, T, D, M, target_rows, vmem_budget_bytes):
    """Largest t-chunk (multiple of 8 dividing T, else T) whose tile fits the budget."""
    cands = sorted({d for d in range(8, T + 1, 8) if T % d == 0} | {T})
    m_pad = max(8, -(-M // 8) * 8)
    d_pad = max(D, 8)

    def est_bytes(tt):
        r = C * tt
        io = 2 * 4 * r * (2 * d_pad + 2 * m_pad)          # double-buffered I/O blocks
        interm = 4 * r * (10 * d_pad + 22 * m_pad)        # conservative live intermediates
        return io + interm + 8 * M * d_pad * 4

    ok = [tt for tt in cands
          if C * tt <= target_rows and est_bytes(tt) <= vmem_budget_bytes]
    if ok:
        return max(ok)
    fit = [tt for tt in cands if est_bytes(tt) <= vmem_budget_bytes]
    return min(fit) if fit else min(cands)


@functools.partial(jax.jit, static_argnames=("target_rows",))
def memory_forward(query, keys, *, target_rows=2048):
    """Train-mode forward of Memory: returns (updated_query, updated_memory,
    score_query, score_memory, separateness_loss, compactness_loss)."""
    B, C, T, D = query.shape
    M, Dk = keys.shape
    assert Dk == D and M >= 2
    N = B * C * T

    vmem_limit = _vmem_limit_bytes()
    tile_t = _choose_tile_t(C, T, D, M, target_rows, vmem_limit // 2)
    nt = T // tile_t
    rows = C * tile_t

    query = query.astype(jnp.float32)
    keys = keys.astype(jnp.float32)

    outs = pl.pallas_call(
        _memory_kernel,
        out_shape=(
            jax.ShapeDtypeStruct((B, C, T, D), jnp.float32),      # updated_query
            jax.ShapeDtypeStruct((B, nt, M, rows), jnp.float32),  # exp(score - lmax), transposed
            jax.ShapeDtypeStruct((B, nt, M, rows), jnp.float32),  # score_memory, transposed
            jax.ShapeDtypeStruct((B, nt, M, 2), jnp.float32),     # local (lmax, lsum)
            jax.ShapeDtypeStruct((B, nt, M, D), jnp.float32),     # query_update partials
            jax.ShapeDtypeStruct((B, nt, 1, 1), jnp.float32),     # compactness partials
            jax.ShapeDtypeStruct((B, nt, 1, 1), jnp.float32),     # separateness partials
        ),
        grid=(B, nt),
        in_specs=[
            pl.BlockSpec((M, D), lambda b, t: (0, 0)),
            pl.BlockSpec((1, C, tile_t, D), lambda b, t: (b, 0, t, 0)),
        ],
        out_specs=(
            pl.BlockSpec((1, C, tile_t, D), lambda b, t: (b, 0, t, 0)),
            pl.BlockSpec((1, 1, M, rows), lambda b, t: (b, t, 0, 0)),
            pl.BlockSpec((1, 1, M, rows), lambda b, t: (b, t, 0, 0)),
            pl.BlockSpec((1, 1, M, 2), lambda b, t: (b, t, 0, 0)),
            pl.BlockSpec((1, 1, M, D), lambda b, t: (b, t, 0, 0)),
            pl.BlockSpec((1, 1, 1, 1), lambda b, t: (b, t, 0, 0)),
            pl.BlockSpec((1, 1, 1, 1), lambda b, t: (b, t, 0, 0)),
        ),
        compiler_params=pltpu.CompilerParams(
            dimension_semantics=("parallel", "parallel"),
            vmem_limit_bytes=vmem_limit,
        ),
    )(keys, query)

    updated_query, eq_t, sm_t, stats, qupd_part, comp_part, sep_part = outs

    # ---- combine local column-softmax stats into global stats (tiny, XLA) ----
    lmax = stats[..., 0]                                    # (B, nt, M)
    lsum = stats[..., 1]
    gmax = jnp.max(lmax, axis=(0, 1))                       # (M,)
    gsum = jnp.sum(lsum * jnp.exp(lmax - gmax), axis=(0, 1))

    # score_query: rescale raw exponentials; undo the in-kernel transposition
    scale = jnp.exp(lmax - gmax) / gsum                     # (B, nt, M)
    sq_t = eq_t * scale[..., None]

    def to_rows(x_t):
        x = x_t.reshape(B, nt, M, C, tile_t)
        x = jnp.transpose(x, (0, 3, 1, 4, 2))               # (B, C, nt, tile_t, M)
        return x.reshape(N, M)                              # row-major (b, c, t)

    score_query = to_rows(sq_t)
    score_memory = to_rows(sm_t)

    # memory update: rescale per-tile partials to the global colmax, sum, add, normalize
    qupd = jnp.sum(qupd_part * jnp.exp(lmax - gmax)[..., None], axis=(0, 1))  # (M, D)
    new_mem = qupd + keys
    updated_memory = new_mem / jnp.maximum(
        jnp.sqrt(jnp.sum(new_mem * new_mem, axis=1, keepdims=True)), 1e-12)

    compactness_loss = jnp.sum(comp_part) / (N * D)
    separateness_loss = jnp.sum(sep_part) / N

    return (updated_query, updated_memory, score_query, score_memory,
            separateness_loss, compactness_loss)


# --------------------------------------------------------------------------------------
# Pure-JAX reference (same math as the PyTorch module) for a sanity comparison.
# --------------------------------------------------------------------------------------
def _memory_ref(query, keys):
    B, C, T, D = query.shape
    M = keys.shape[0]
    N = B * C * T
    qn = query / jnp.maximum(jnp.linalg.norm(query, axis=1, keepdims=True), 1e-12)
    qr = qn.reshape(N, D)
    score = qr @ keys.T
    sq = jax.nn.softmax(score, axis=0)
    sm = jax.nn.softmax(score, axis=1)
    uq = (sm @ keys).reshape(B, C, T, D)
    return uq, sq, sm


if __name__ == "__main__":
    import numpy as np

    # batch, cpd_channels, t_length, dims, memory_size
    B, C, T, D, M = 2, 4, 8, 32, 10
    rng = jax.random.PRNGKey(0)
    kq, kk = jax.random.split(rng)
    query = jax.random.normal(kq, (B, C, T, D), dtype=jnp.float32)
    keys = jax.random.normal(kk, (M, D), dtype=jnp.float32)
    keys = keys / jnp.maximum(jnp.linalg.norm(keys, axis=1, keepdims=True), 1e-12)

    outs = memory_forward(query, keys)
    outs = jax.block_until_ready(outs)
    uq, um, sq, sm, sep, comp = outs

    # structural invariants
    assert uq.shape == (B, C, T, D) and um.shape == (M, D)
    assert sq.shape == (B * C * T, M) and sm.shape == (B * C * T, M)
    np.testing.assert_allclose(np.asarray(jnp.sum(sm, axis=1)), 1.0, atol=1e-3)
    np.testing.assert_allclose(np.asarray(jnp.sum(sq, axis=0)), 1.0, atol=1e-3)
    np.testing.assert_allclose(np.asarray(jnp.linalg.norm(um, axis=1)), 1.0, atol=1e-3)
    assert bool(jnp.isfinite(sep)) and bool(jnp.isfinite(comp))
    assert float(comp) >= 0.0 and float(sep) >= 0.0

    # argmax-independent outputs vs. pure-JAX reference (loose: MXU vs XLA matmul rounding)
    ref_uq, ref_sq, ref_sm = _memory_ref(query, keys)
    np.testing.assert_allclose(np.asarray(uq), np.asarray(ref_uq), rtol=5e-2, atol=5e-3)
    np.testing.assert_allclose(np.asarray(sq), np.asarray(ref_sq), rtol=5e-2, atol=5e-3)
    np.testing.assert_allclose(np.asarray(sm), np.asarray(ref_sm), rtol=5e-2, atol=5e-3)

    print("KERNEL_OK")
</pallas_src>

<mosaic_0001>
module attributes {stable_mosaic.version = 11 : i64} {
  func.func @_memory_kernel(%arg0: i32, %arg1: i32, %arg2: memref<10x32xf32, #tpu.memory_space<vmem>>, %arg3: memref<1x4x8x32xf32, #tpu.memory_space<vmem>>, %arg4: memref<1x4x8x32xf32, #tpu.memory_space<vmem>>, %arg5: memref<1x1x10x32xf32, #tpu.memory_space<vmem>>, %arg6: memref<1x1x10x32xf32, #tpu.memory_space<vmem>>, %arg7: memref<1x1x10x2xf32, #tpu.memory_space<vmem>>, %arg8: memref<1x1x10x32xf32, #tpu.memory_space<vmem>>, %arg9: memref<1x1x1x1xf32, #tpu.memory_space<vmem>>, %arg10: memref<1x1x1x1xf32, #tpu.memory_space<vmem>>) attributes {dimension_semantics = [#tpu.dimension_semantics<parallel>, #tpu.dimension_semantics<parallel>], iteration_bounds = array<i64: 2, 1>, scalar_prefetch = 0 : i64, scratch_operands = 0 : i64, tpu.core_type = #tpu.core_type<tc>, window_params = [{pipeline_mode = #tpu.pipeline_mode<synchronous>, transform_indices = @transform_0, window_bounds = array<i64: 10, 32>}, {transform_indices = @transform_1, window_bounds = array<i64: 1, 4, 8, 32>}, {transform_indices = @transform_2, window_bounds = array<i64: 1, 4, 8, 32>}, {transform_indices = @transform_3, window_bounds = array<i64: 1, 1, 10, 32>}, {transform_indices = @transform_4, window_bounds = array<i64: 1, 1, 10, 32>}, {transform_indices = @transform_5, window_bounds = array<i64: 1, 1, 10, 2>}, {transform_indices = @transform_6, window_bounds = array<i64: 1, 1, 10, 32>}, {transform_indices = @transform_7, window_bounds = array<i64: 1, 1, 1, 1>}, {transform_indices = @transform_8, window_bounds = array<i64: 1, 1, 1, 1>}]} {
    %c0 = arith.constant 0 : index
    %c0_0 = arith.constant 0 : index
    %c0_1 = arith.constant 0 : index
    %c0_2 = arith.constant 0 : index
    %0 = vector.load %arg3[%c0, %c0_0, %c0_1, %c0_2] : memref<1x4x8x32xf32, #tpu.memory_space<vmem>>, vector<1x4x8x32xf32>
    %1 = arith.mulf %0, %0 : vector<1x4x8x32xf32>
    %cst = arith.constant dense<0.000000e+00> : vector<1x8x32xf32>
    %2 = vector.multi_reduction <add>, %1, %cst [1] : vector<1x4x8x32xf32> to vector<1x8x32xf32>
    %3 = vector.shape_cast %2 : vector<1x8x32xf32> to vector<1x1x8x32xf32>
    %cst_3 = arith.constant 1.000000e-24 : f32
    %4 = vector.broadcast %cst_3 : f32 to vector<1x1x8x32xf32>
    %5 = arith.maximumf %3, %4 : vector<1x1x8x32xf32>
    %6 = math.rsqrt %5 : vector<1x1x8x32xf32>
    %7 = vector.broadcast %6 : vector<1x1x8x32xf32> to vector<1x4x8x32xf32>
    %8 = arith.mulf %0, %7 : vector<1x4x8x32xf32>
    %9 = vector.shape_cast %8 : vector<1x4x8x32xf32> to vector<32x32xf32>
    %c0_4 = arith.constant 0 : index
    %c0_5 = arith.constant 0 : index
    %10 = vector.load %arg2[%c0_4, %c0_5] : memref<10x32xf32, #tpu.memory_space<vmem>>, vector<10x32xf32>
    %cst_6 = arith.constant dense<0.000000e+00> : vector<10x32xf32>
    %11 = tpu.matmul %10, %9, %cst_6 {dimension_numbers = #tpu.dot_dimension_numbers<[1], [1], [0], [0], [0, 0, 1, 0], [], []>} : vector<10x32xf32>, vector<32x32xf32>, vector<10x32xf32> -> vector<10x32xf32>
    %cst_7 = arith.constant dense<0xFF800000> : vector<32xf32>
    %12 = vector.multi_reduction <maximumf>, %11, %cst_7 [0] : vector<10x32xf32> to vector<32xf32>
    %13 = vector.shape_cast %12 : vector<32xf32> to vector<1x32xf32>
    %14 = vector.broadcast %13 : vector<1x32xf32> to vector<10x32xf32>
    %15 = arith.subf %11, %14 : vector<10x32xf32>
    %16 = math.exp %15 : vector<10x32xf32>
    %cst_8 = arith.constant dense<0.000000e+00> : vector<32xf32>
    %17 = vector.multi_reduction <add>, %16, %cst_8 [0] : vector<10x32xf32> to vector<32xf32>
    %18 = vector.shape_cast %17 : vector<32xf32> to vector<1x32xf32>
    %19 = tpu.reciprocal %18 {approx = true} : vector<1x32xf32> -> vector<1x32xf32>
    %20 = arith.mulf %18, %19 : vector<1x32xf32>
    %cst_9 = arith.constant 2.000000e+00 : f32
    %21 = vector.broadcast %cst_9 : f32 to vector<1x32xf32>
    %22 = arith.subf %21, %20 : vector<1x32xf32>
    %23 = arith.mulf %19, %22 : vector<1x32xf32>
    %24 = vector.broadcast %23 : vector<1x32xf32> to vector<10x32xf32>
    %25 = arith.mulf %16, %24 : vector<10x32xf32>
    %cst_10 = arith.constant dense<0xFF800000> : vector<10xf32>
    %26 = vector.multi_reduction <maximumf>, %11, %cst_10 [1] : vector<10x32xf32> to vector<10xf32>
    %27 = vector.shape_cast %26 : vector<10xf32> to vector<10x1xf32>
    %28 = vector.broadcast %27 : vector<10x1xf32> to vector<10x32xf32>
    %29 = arith.subf %11, %28 : vector<10x32xf32>
    %30 = math.exp %29 : vector<10x32xf32>
    %cst_11 = arith.constant dense<0.000000e+00> : vector<10xf32>
    %31 = vector.multi_reduction <add>, %30, %cst_11 [1] : vector<10x32xf32> to vector<10xf32>
    %32 = vector.shape_cast %31 : vector<10xf32> to vector<10x1xf32>
    %33 = tpu.iota {dimensions = array<i32: 0>} : vector<10x32xi32>
    %34 = vector.broadcast %13 : vector<1x32xf32> to vector<10x32xf32>
    %35 = arith.cmpf oeq, %11, %34 : vector<10x32xf32>
    %c10_i32 = arith.constant 10 : i32
    %36 = vector.broadcast %c10_i32 : i32 to vector<10x32xi32>
    %37 = arith.select %35, %33, %36 : vector<10x32xi1>, vector<10x32xi32>
    %cst_12 = arith.constant dense<2147483647> : vector<32xi32>
    %38 = vector.multi_reduction <minsi>, %37, %cst_12 [0] : vector<10x32xi32> to vector<32xi32>
    %39 = vector.shape_cast %38 : vector<32xi32> to vector<1x32xi32>
    %40 = vector.broadcast %39 : vector<1x32xi32> to vector<10x32xi32>
    %41 = arith.cmpi eq, %33, %40 : vector<10x32xi32>
    %cst_13 = arith.constant 0xFF800000 : f32
    %42 = vector.broadcast %cst_13 : f32 to vector<10x32xf32>
    %43 = arith.select %41, %42, %11 : vector<10x32xi1>, vector<10x32xf32>
    %cst_14 = arith.constant dense<0xFF800000> : vector<32xf32>
    %44 = vector.multi_reduction <maximumf>, %43, %cst_14 [0] : vector<10x32xf32> to vector<32xf32>
    %45 = vector.shape_cast %44 : vector<32xf32> to vector<1x32xf32>
    %46 = vector.broadcast %45 : vector<1x32xf32> to vector<10x32xf32>
    %47 = arith.cmpf oeq, %43, %46 : vector<10x32xf32>
    %c10_i32_15 = arith.constant 10 : i32
    %48 = vector.broadcast %c10_i32_15 : i32 to vector<10x32xi32>
    %49 = arith.select %47, %33, %48 : vector<10x32xi1>, vector<10x32xi32>
    %cst_16 = arith.constant dense<2147483647> : vector<32xi32>
    %50 = vector.multi_reduction <minsi>, %49, %cst_16 [0] : vector<10x32xi32> to vector<32xi32>
    %51 = vector.shape_cast %50 : vector<32xi32> to vector<1x32xi32>
    %52 = arith.extui %41 : vector<10x32xi1> to vector<10x32xi32>
    %53 = arith.sitofp %52 : vector<10x32xi32> to vector<10x32xf32>
    %54 = vector.broadcast %51 : vector<1x32xi32> to vector<10x32xi32>
    %55 = arith.cmpi eq, %33, %54 : vector<10x32xi32>
    %56 = arith.extui %55 : vector<10x32xi1> to vector<10x32xi32>
    %57 = arith.sitofp %56 : vector<10x32xi32> to vector<10x32xf32>
    %58 = tpu.concatenate %25, %53, %57 in 1 : vector<10x32xf32>, vector<10x32xf32>, vector<10x32xf32> -> vector<10x96xf32>
    %cst_17 = arith.constant dense<0.000000e+00> : vector<96x32xf32>
    %59 = tpu.matmul %58, %10, %cst_17 {dimension_numbers = #tpu.dot_dimension_numbers<[0], [0], [1], [1], [0, 1, 1, 1], [], []>} : vector<10x96xf32>, vector<10x32xf32>, vector<96x32xf32> -> vector<96x32xf32>
    %60 = vector.extract_strided_slice %59 {offsets = [0, 0], sizes = [32, 32], strides = [1, 1]} : vector<96x32xf32> to vector<32x32xf32>
    %61 = vector.extract_strided_slice %59 {offsets = [32, 0], sizes = [32, 32], strides = [1, 1]} : vector<96x32xf32> to vector<32x32xf32>
    %62 = vector.extract_strided_slice %59 {offsets = [64, 0], sizes = [32, 32], strides = [1, 1]} : vector<96x32xf32> to vector<32x32xf32>
    %63 = arith.subf %9, %61 : vector<32x32xf32>
    %64 = arith.mulf %63, %63 : vector<32x32xf32>
    %cst_18 = arith.constant dense<0.000000e+00> : vector<32xf32>
    %65 = vector.multi_reduction <add>, %64, %cst_18 [1] : vector<32x32xf32> to vector<32xf32>
    %66 = vector.shape_cast %65 : vector<32xf32> to vector<32x1xf32>
    %cst_19 = arith.constant dense<0.000000e+00> : vector<1xf32>
    %67 = vector.multi_reduction <add>, %66, %cst_19 [0] : vector<32x1xf32> to vector<1xf32>
    %68 = vector.shape_cast %67 : vector<1xf32> to vector<1x1xf32>
    %cst_20 = arith.constant 9.99999997E-7 : f32
    %69 = vector.broadcast %cst_20 : f32 to vector<32x32xf32>
    %70 = arith.addf %63, %69 : vector<32x32xf32>
    %71 = arith.subf %9, %62 : vector<32x32xf32>
    %cst_21 = arith.constant 9.99999997E-7 : f32
    %72 = vector.broadcast %cst_21 : f32 to vector<32x32xf32>
    %73 = arith.addf %71, %72 : vector<32x32xf32>
    %74 = arith.mulf %70, %70 : vector<32x32xf32>
    %cst_22 = arith.constant dense<0.000000e+00> : vector<32xf32>
    %75 = vector.multi_reduction <add>, %74, %cst_22 [1] : vector<32x32xf32> to vector<32xf32>
    %76 = vector.shape_cast %75 : vector<32xf32> to vector<32x1xf32>
    %77 = math.sqrt %76 : vector<32x1xf32>
    %78 = arith.mulf %73, %73 : vector<32x32xf32>
    %cst_23 = arith.constant dense<0.000000e+00> : vector<32xf32>
    %79 = vector.multi_reduction <add>, %78, %cst_23 [1] : vector<32x32xf32> to vector<32xf32>
    %80 = vector.shape_cast %79 : vector<32xf32> to vector<32x1xf32>
    %81 = math.sqrt %80 : vector<32x1xf32>
    %82 = arith.subf %77, %81 : vector<32x1xf32>
    %cst_24 = arith.constant 1.000000e+00 : f32
    %83 = vector.broadcast %cst_24 : f32 to vector<32x1xf32>
    %84 = arith.addf %82, %83 : vector<32x1xf32>
    %cst_25 = arith.constant 0.000000e+00 : f32
    %85 = vector.broadcast %cst_25 : f32 to vector<32x1xf32>
    %86 = arith.maximumf %84, %85 : vector<32x1xf32>
    %cst_26 = arith.constant dense<0.000000e+00> : vector<1xf32>
    %87 = vector.multi_reduction <add>, %86, %cst_26 [0] : vector<32x1xf32> to vector<1xf32>
    %88 = vector.shape_cast %87 : vector<1xf32> to vector<1x1xf32>
    %89 = arith.mulf %53, %30 : vector<10x32xf32>
    %cst_27 = arith.constant dense<0.000000e+00> : vector<10x32xf32>
    %90 = tpu.matmul %89, %9, %cst_27 {dimension_numbers = #tpu.dot_dimension_numbers<[1], [0], [0], [1], [0, 0, 1, 1], [], []>} : vector<10x32xf32>, vector<32x32xf32>, vector<10x32xf32> -> vector<10x32xf32>
    %91 = vector.shape_cast %60 : vector<32x32xf32> to vector<1x4x8x32xf32>
    %c0_28 = arith.constant 0 : index
    %c0_29 = arith.constant 0 : index
    %c0_30 = arith.constant 0 : index
    %c0_31 = arith.constant 0 : index
    %92 = vector.load %arg4[%c0_28, %c0_29, %c0_30, %c0_31] : memref<1x4x8x32xf32, #tpu.memory_space<vmem>>, vector<1x4x8x32xf32>
    tpu.vector_store %arg4[%c0_28, %c0_29, %c0_30, %c0_31], %91 {strides = array<i32>} : memref<1x4x8x32xf32, #tpu.memory_space<vmem>>, vector<1x4x8x32xf32>,
    %93 = vector.shape_cast %30 : vector<10x32xf32> to vector<1x1x10x32xf32>
    %c0_32 = arith.constant 0 : index
    %c0_33 = arith.constant 0 : index
    %c0_34 = arith.constant 0 : index
    %c0_35 = arith.constant 0 : index
    %94 = vector.load %arg5[%c0_32, %c0_33, %c0_34, %c0_35] : memref<1x1x10x32xf32, #tpu.memory_space<vmem>>, vector<1x1x10x32xf32>
    tpu.vector_store %arg5[%c0_32, %c0_33, %c0_34, %c0_35], %93 {strides = array<i32>} : memref<1x1x10x32xf32, #tpu.memory_space<vmem>>, vector<1x1x10x32xf32>,
    %95 = vector.shape_cast %25 : vector<10x32xf32> to vector<1x1x10x32xf32>
    %c0_36 = arith.constant 0 : index
    %c0_37 = arith.constant 0 : index
    %c0_38 = arith.constant 0 : index
    %c0_39 = arith.constant 0 : index
    %96 = vector.load %arg6[%c0_36, %c0_37, %c0_38, %c0_39] : memref<1x1x10x32xf32, #tpu.memory_space<vmem>>, vector<1x1x10x32xf32>
    tpu.vector_store %arg6[%c0_36, %c0_37, %c0_38, %c0_39], %95 {strides = array<i32>} : memref<1x1x10x32xf32, #tpu.memory_space<vmem>>, vector<1x1x10x32xf32>,
    %97 = tpu.concatenate %27, %32 in 1 : vector<10x1xf32>, vector<10x1xf32> -> vector<10x2xf32>
    %98 = vector.shape_cast %97 : vector<10x2xf32> to vector<1x1x10x2xf32>
    %c0_40 = arith.constant 0 : index
    %c0_41 = arith.constant 0 : index
    %c0_42 = arith.constant 0 : index
    %c0_43 = arith.constant 0 : index
    %99 = vector.load %arg7[%c0_40, %c0_41, %c0_42, %c0_43] : memref<1x1x10x2xf32, #tpu.memory_space<vmem>>, vector<1x1x10x2xf32>
    tpu.vector_store %arg7[%c0_40, %c0_41, %c0_42, %c0_43], %98 {strides = array<i32>} : memref<1x1x10x2xf32, #tpu.memory_space<vmem>>, vector<1x1x10x2xf32>,
    %100 = vector.shape_cast %90 : vector<10x32xf32> to vector<1x1x10x32xf32>
    %c0_44 = arith.constant 0 : index
    %c0_45 = arith.constant 0 : index
    %c0_46 = arith.constant 0 : index
    %c0_47 = arith.constant 0 : index
    %101 = vector.load %arg8[%c0_44, %c0_45, %c0_46, %c0_47] : memref<1x1x10x32xf32, #tpu.memory_space<vmem>>, vector<1x1x10x32xf32>
    tpu.vector_store %arg8[%c0_44, %c0_45, %c0_46, %c0_47], %100 {strides = array<i32>} : memref<1x1x10x32xf32, #tpu.memory_space<vmem>>, vector<1x1x10x32xf32>,
    %102 = vector.shape_cast %68 : vector<1x1xf32> to vector<1x1x1x1xf32>
    %c0_48 = arith.constant 0 : index
    %c0_49 = arith.constant 0 : index
    %c0_50 = arith.constant 0 : index
    %c0_51 = arith.constant 0 : index
    %103 = vector.load %arg9[%c0_48, %c0_49, %c0_50, %c0_51] : memref<1x1x1x1xf32, #tpu.memory_space<vmem>>, vector<1x1x1x1xf32>
    tpu.vector_store %arg9[%c0_48, %c0_49, %c0_50, %c0_51], %102 {strides = array<i32>} : memref<1x1x1x1xf32, #tpu.memory_space<vmem>>, vector<1x1x1x1xf32>,
    %104 = vector.shape_cast %88 : vector<1x1xf32> to vector<1x1x1x1xf32>
    %c0_52 = arith.constant 0 : index
    %c0_53 = arith.constant 0 : index
    %c0_54 = arith.constant 0 : index
    %c0_55 = arith.constant 0 : index
    %105 = vector.load %arg10[%c0_52, %c0_53, %c0_54, %c0_55] : memref<1x1x1x1xf32, #tpu.memory_space<vmem>>, vector<1x1x1x1xf32>
    tpu.vector_store %arg10[%c0_52, %c0_53, %c0_54, %c0_55], %104 {strides = array<i32>} : memref<1x1x1x1xf32, #tpu.memory_space<vmem>>, vector<1x1x1x1xf32>,
    return
  }
  func.func @transform_0(%arg0: i32, %arg1: i32) -> (i32, i32) {
    %c0_i32 = arith.constant 0 : i32
    %c0_i32_0 = arith.constant 0 : i32
    %c0_i32_1 = arith.constant 0 : i32
    return %c0_i32, %c0_i32_0 : i32, i32
  }
  func.func @transform_1(%arg0: i32, %arg1: i32) -> (i32, i32, i32, i32) {
    %c0_i32 = arith.constant 0 : i32
    %c0_i32_0 = arith.constant 0 : i32
    %c0_i32_1 = arith.constant 0 : i32
    return %arg0, %c0_i32, %arg1, %c0_i32_0 : i32, i32, i32, i32
  }
  func.func @transform_2(%arg0: i32, %arg1: i32) -> (i32, i32, i32, i32) {
    %c0_i32 = arith.constant 0 : i32
    %c0_i32_0 = arith.constant 0 : i32
    %c0_i32_1 = arith.constant 0 : i32
    return %arg0, %c0_i32, %arg1, %c0_i32_0 : i32, i32, i32, i32
  }
  func.func @transform_3(%arg0: i32, %arg1: i32) -> (i32, i32, i32, i32) {
    %c0_i32 = arith.constant 0 : i32
    %c0_i32_0 = arith.constant 0 : i32
    %c0_i32_1 = arith.constant 0 : i32
    return %arg0, %arg1, %c0_i32, %c0_i32_0 : i32, i32, i32, i32
  }
  func.func @transform_4(%arg0: i32, %arg1: i32) -> (i32, i32, i32, i32) {
    %c0_i32 = arith.constant 0 : i32
    %c0_i32_0 = arith.constant 0 : i32
    %c0_i32_1 = arith.constant 0 : i32
    return %arg0, %arg1, %c0_i32, %c0_i32_0 : i32, i32, i32, i32
  }
  func.func @transform_5(%arg0: i32, %arg1: i32) -> (i32, i32, i32, i32) {
    %c0_i32 = arith.constant 0 : i32
    %c0_i32_0 = arith.constant 0 : i32
    %c0_i32_1 = arith.constant 0 : i32
    return %arg0, %arg1, %c0_i32, %c0_i32_0 : i32, i32, i32, i32
  }
  func.func @transform_6(%arg0: i32, %arg1: i32) -> (i32, i32, i32, i32) {
    %c0_i32 = arith.constant 0 : i32
    %c0_i32_0 = arith.constant 0 : i32
    %c0_i32_1 = arith.constant 0 : i32
    return %arg0, %arg1, %c0_i32, %c0_i32_0 : i32, i32, i32, i32
  }
  func.func @transform_7(%arg0: i32, %arg1: i32) -> (i32, i32, i32, i32) {
    %c0_i32 = arith.constant 0 : i32
    %c0_i32_0 = arith.constant 0 : i32
    %c0_i32_1 = arith.constant 0 : i32
    return %arg0, %arg1, %c0_i32, %c0_i32_0 : i32, i32, i32, i32
  }
  func.func @transform_8(%arg0: i32, %arg1: i32) -> (i32, i32, i32, i32) {
    %c0_i32 = arith.constant 0 : i32
    %c0_i32_0 = arith.constant 0 : i32
    %c0_i32_1 = arith.constant 0 : i32
    return %arg0, %arg1, %c0_i32, %c0_i32_0 : i32, i32, i32, i32
  }
}

</mosaic_0001>

<bundles_post_ra>
// kernel: memory_forward.1
= control target key start
LH: loop header
LB: loop body
LE: loop exit
PB: predicated region body
PF: predicated region fallthrough
CT: control target
= control target key end

     0   :  { %s2422_s0 = inlined_call_operand.hbm [shape: f32[10,32], index: 0, kind: input, shape index: {}]   ;;  %s2423_s1 = inlined_call_operand.hbm [shape: f32[2,4,8,32], index: 1, kind: input, shape index: {}]   ;;  %s2424_s2 = inlined_call_operand.hbm [shape: f32[2,4,8,32], index: 2, kind: output, shape index: {0}]   ;;  %s2425_s3 = inlined_call_operand.vmem [shape: f32[2,1,10,32], index: 3, kind: output, shape index: {1}]   ;;  %s2426_s4 = inlined_call_operand.vmem [shape: f32[2,1,10,32], index: 4, kind: output, shape index: {2}]   ;;  %s2427_s5 = inlined_call_operand.vmem [shape: f32[2,1,10,2], index: 5, kind: output, shape index: {3}]   ;;  %s2428_s6 = inlined_call_operand.vmem [shape: f32[2,1,10,32], index: 6, kind: output, shape index: {4}]   ;;  %s2429_s7 = inlined_call_operand.vmem [shape: f32[2,1,1,1], index: 7, kind: output, shape index: {5}]   ;;  %s2430_s8 = inlined_call_operand.vmem [shape: f32[2,1,1,1], index: 8, kind: output, shape index: {6}]  }
   0x1   :  { %2438 = sst [smem:[#allocation15_spill]] %s2422_s0 }
   0x2   :  { %14 = vsyncpa [#allocation3], 0 }
   0x3   :  { %15 = vsyncpa [#allocation6], 0 }
   0x4   :  { %17 = vsyncpa [#allocation6 + $0x1], 0 }
   0x5   :  { %18 = vsyncpa [#allocation4], 0 }
   0x6   :  { %20 = vsyncpa [#allocation4 + $0x1], 0  ;;  %s2000_s27 = smov 0   ;;  %s2002_s28 = smov 0  }
   0x7   :  { %s2004_s29 = smov 0   ;;  %s2006_s30 = smov 0  }
   0x8   :  { %s2008_s9 = smov 0   ;;  %s2010_s10 = smov 0  }
   0x9 LB: > { %2439 = sst [smem:[#allocation11_spill]] %s1923_s27  ;;  %s1566_s11 = sadd.s32 4294967295, %s1943_s10   ;;  %s1943_s10 = sphi %s2010_s10, %s26_s10   ;;  %s1939_s9 = sphi %s2008_s9, %s2461_s9   ;;  %s1935_s30 = sphi %s2006_s30, %s2460_s30   ;;  %s1931_s29 = sphi %s2004_s29, %s2464_s29   ;;  %s1927_s28 = sphi %s2002_s28, %s2463_s28   ;;  %s1923_s27 = sphi %s2000_s27, %s2462_s27  }
   0xa   : > { %2440 = sst [smem:[#allocation12_spill]] %s1939_s9  ;;  %s1567_s12 = sadd.s32 4294967294, %s1943_s10  }
   0xb   : > { %p81_p0 = scmp.ne.s32.totalorder %s1927_s28, %s1923_s27  ;;  %p2034_p1 = scmp.eq.s32.totalorder %s1566_s11, 0 }
   0xc   : > { %p2038_p2 = scmp.eq.s32.totalorder %s1566_s11, 1  ;;  %p113_p3 = scmp.eq.s32.totalorder %s1567_s12, 1 }
   0xd   : > { %p2044_p4 = por %p2034_p1, %p81_p0  ;;  %p1568_p5 = scmp.ge.s32.totalorder %s1943_s10, 1 }
   0xe   : > { %p2049_p6 = por %p113_p3, %p81_p0  ;;  %p288_p7 = scmp.lt.s32.totalorder %s1943_s10, 3 }
   0xf   : > { %s2443_s15 = scalar_select %p2044_p4, 1, 0 }
  0x10   : > { %s2444_s16 = scalar_select %p2049_p6, 1, 0 }
  0x11   : > { %p2054_p8 = pnand %p1568_p5, %p288_p7  ;;  %s1945_s18 = smov [#allocation2]  }
  0x12   : > { %2445 = sst [smem:[#allocation13_spill]] %s2444_s16  ;;  %s300_s19 = sshll.u32 %s1945_s18, 4  ;;  %s301_s19 = int_to_ptr.vmem [resolvable:$true] %s300_s19 }
  0x13   : > { %p1700_p9 = pneg %p2054_p8  ;;  %s38_s21 = sadd.s32 1, %s1939_s9 }
  0x14   : > { %s1816_s22 = scalar_lea.vmem %s301_s19, 256  ;;  %p1824_p5 = scmp.lt.s32.totalorder %s301_s19, %s301_s19 }
  0x15   : > { %p2063_p11 = pnand %p1700_p9, %p2034_p1  ;;  %p1817_p13 = scmp.ne.s32.totalorder %s301_s19, %s1816_s22 }
  0x16   : > { %p1825_p7 = scmp.lt.s32.totalorder %s1816_s22, %s1816_s22 }
  0x17   : > { %p1807_p12 = pneg %p2063_p11 }
  0x18   : > { %p1826_p6 = por %p1825_p7, %p1824_p5 }
  0x19   : > { %p1819_p0 = pnand %p1817_p13, %p1807_p12 }
  0x1b   : > { %p1820_p3 = pneg %p1819_p0 }
  0x1d   : > { %p1827_p4 = pnand %p1826_p6, %p1820_p3 }
  0x1f   : > { %1830 = shalt.err (!%p1827_p4)
}
  0x20   : > { %s2432_s23 = smov 128   ;;  %s2433_s24 = smov 8  }
  0x21   : > { %s2448_s0 = sld [smem:[#allocation15_spill]]  ;;  %p40_p4 = scmp.ge.s32.totalorder %s38_s21, 2 }
  0x22   : > { %s68_s11 = sadd.s32 1, %s1931_s29  ;;  %p75_p6 = scmp.ne.s32.totalorder %s1931_s29, %s1927_s28 }
  0x23   : > { %p76_p9 = scmp.eq.s32.totalorder %s1943_s10, 0  ;;  %s2466_s21 = smov (%p40_p4, %s38_s21), 0 }
  0x24   : > { %2449 = sst [smem:[#allocation14_spill]] %s2466_s21  ;;  %p2090_p13 = por %p2038_p2, %p75_p6 }
  0x25   : > { %p2084_p12 = por %p76_p9, %p75_p6  ;;  %s63_s20 = ssub.s32 %s1939_s9, %s2466_s21 }
  0x26   : > { %p1713_p0 = scmp.lt.s32.totalorder %s1943_s10, 2  ;;  %s1616_s26 = sshll.u32 %s1939_s9, 9 }
  0x27   : > { %1703 = dma.hbm_to_vmem [thread:$0]  (!%p2063_p11), %s2448_s0, 256, %s301_s19, [#allocation3], %s2432_s23, %s2432_s23, %s2433_s24  }
  0x28   : > { %p66_p11 = scmp.eq.s32.totalorder %s63_s20, 0  ;;  %s314_s19 = sand.u32 1, %s1931_s29  }
  0x29   : > { %s1571_s22 = sshll.u32 %s314_s19, 5  ;;  %s325_s0 = scalar_lea.hbm %s2423_s1, %s1616_s26 }
  0x2a   : > { %s2099_s25 = scalar_select %p66_p11, %s1931_s29, %s68_s11  }
  0x2b   : > { %s318_s16 = scalar_lea.vmem [#allocation5], %s1571_s22  ;;  %p2107_p2 = pnand %p1713_p0, %p2084_p12 }
  0x2c   : > { %s326_s27 = sshll.u32 %s318_s16, 4  ;;  %s315_s21 = scalar_lea.sflag [#allocation6], %s314_s19  ;;  %s327_s27 = int_to_ptr.vmem [resolvable:$true] %s326_s27 }
  0x2d   : > { %p1833_p3 = pneg %p2107_p2  ;;  %s1844_s20 = scalar_lea.vmem %s327_s27, 512 }
  0x2e   : > { %p1845_p5 = scmp.ne.s32.totalorder %s327_s27, %s1844_s20  ;;  %s1948_s11 = smov [#allocation5]  }
  0x2f   : > { %s1849_s9 = sshll.u32 %s1948_s11, 4  ;;  %s1850_s9 = int_to_ptr.vmem [resolvable:$false] %s1849_s9 }
  0x30   : > { %p1847_p7 = pnand %p1845_p5, %p1833_p3  ;;  %s1851_s23 = scalar_lea.vmem %s1850_s9, 1024 }
  0x31   : > { %p1852_p6 = scmp.lt.s32.totalorder %s327_s27, %s1850_s9  ;;  %p1853_p9 = scmp.lt.s32.totalorder %s1851_s23, %s1844_s20 }
  0x32   : > { %p1848_p4 = pneg %p1847_p7 }
  0x33   : > { %p1854_p11 = por %p1853_p9, %p1852_p6 }
  0x35   : > { %p1855_p10 = pnand %p1854_p11, %p1848_p4 }
  0x37   : > { %1858 = shalt.err (!%p1855_p10)
}
  0x38   : > { %s2453_s16 = smov 8   ;;  %s2454_s24 = smov 128  }
  0x39   : > { %1707 = dma.hbm_to_vmem [thread:$0]  (!%p2107_p2), %s325_s0, 512, %s327_s27, %s315_s21, %s2454_s24, %s2454_s24, %s2453_s16  }
  0x3a   : > { %338 = sbr.rel (%p2054_p8) target bundleno = 1046 (0x416), region = 28 }
  0x3f   : > { %1910 = dma.done.wait (%p2034_p1), [#allocation3], 256  }
  0x40   : > { %1912 = vsyncadd (%p2034_p1), [#allocation3], 4294967040  ;;  %s2125_s9 = sand.u32 1, %s1927_s28   ;;  %p2455_p10 = scmp.ne.s32.totalorder %s2443_s15, 0 }
  0x41   : > { %s1576_s12 = sshll.u32 %s2125_s9, 5  ;;  %s345_s19 = scalar_lea.sflag [#allocation6], %s2125_s9 }
  0x42   : > { %s348_s0 = scalar_lea.vmem [#allocation5], %s1576_s12 }
  0x43   : > { %1914 = dma.done.wait (%p2455_p10), %s345_s19, 512  }
  0x44   : > { %1916 = vsyncadd (%p2455_p10), %s345_s19, 4294966784  ;;  %v477_v0 = vld [vmem:[%s348_s0] sm:$0xff]  ;;  %v478_v1 = vld [vmem:[%s348_s0 + $0x8] sm:$0xff]  ;;  %vm485_vm0 = vcmask 261120   ;;  %vm595_vm1 = vcmask 254976   ;;  %v641_v29 = vlaneseq  ;;  %v1949_v56 = vmov 0.0  }
  0x45   : > { %v479_v2 = vld [vmem:[%s348_s0 + $0x10] sm:$0xff]  ;;  %v480_v3 = vld [vmem:[%s348_s0 + $0x18] sm:$0xff]  ;;  %v481_v4 = vmul.f32 %v477_v0, %v477_v0  ;;  %v482_v5 = vmul.f32 %v478_v1, %v478_v1  ;;  %s1950_s27 = smov 32   ;;  %p429_p1 = scmp.lt.s32.totalorder %s1935_s30, 1 }
  0x46   : > { %v483_v6 = vmul.f32 %v479_v2, %v479_v2  ;;  %v2135_v7 = vld [vmem:[#allocation2] sm:$0xff]  ;;  %v484_v8 = vmul.f32 %v480_v3, %v480_v3  ;;  %v2167_v22 = vld [vmem:[#allocation2 + $0x8] sm:$0x3]  ;;  %v2193_v32 = vshrl.u32 %v641_v29, 7  ;;  %s1951_s17 = smov 64   ;;  %s2301_s19 = scalar_lea.vmem [#allocation7], %s1576_s12 }
  0x47   : > { %1656 = vmatprep.mubr.msk.f32.mxu0 %vm485_vm0, %v2135_v7  ;;  %v486_v9 = vsel %vm485_vm0, %v481_v4, 0.0  ;;  %v487_v10 = vsel %vm485_vm0, %v482_v5, 0.0  ;;  %s2232_s13 = scalar_select %p429_p1, %s1935_s30, 1 }
  0x48   : > { %v489_v11 = vsel %vm485_vm0, %v483_v6, 0.0  ;;  %v488_v12 = vadd.f32 %v487_v10, %v486_v9  ;;  %v491_v13 = vsel %vm485_vm0, %v484_v8, 0.0  ;;  %v2196_v35 = vadd.s32 8, %v2193_v32  ;;  %s1235_s12 = sshll.u32 %s2301_s19, 4  ;;  %s1621_s0 = sshll.u32 %s1935_s30, 9  ;;  %s2336_s12 = int_to_ptr.vmem [resolvable:$true] %s1235_s12 }
  0x49   : > { %s2235_s15 = sshll.u32 %s2232_s13, 4  ;;  %s2342_s21 = scalar_lea.hbm %s2424_s2, %s1621_s0 }
  0x4a   : > { %v490_v14 = vadd.f32 %v489_v11, %v488_v12  ;;  %s446_s26 = scalar_lea.vmem %s2426_s4, %s2235_s15  ;;  %s437_s11 = scalar_lea.vmem %s2425_s3, %s2235_s15 }
  0x4b   : > { %s464_s24 = scalar_lea.vmem %s2428_s6, %s2235_s15  ;;  %s1173_s22 = scalar_lea.sflag [#allocation4], %s2125_s9 }
  0x4c   : > { %v492_v15 = vadd.f32 %v491_v13, %v490_v14  ;;  %s1952_s14 = smov [#allocation7]  }
  0x4d   : > { %s1863_s20 = sshll.u32 %s1952_s14, 4  ;;  %s1864_s20 = int_to_ptr.vmem [resolvable:$false] %s1863_s20 }
  0x4e   : > { %v493_v16 = vmax.f32 %v492_v15, 1e-24  ;;  %p1866_p2 = scmp.lt.s32.totalorder %s2336_s12, %s1864_s20 }
  0x50   : > { %1777 = vrsqrt.f32 %v493_v16 }
  0x5d   : > { %v1778_v17 = vpop.eup %1777 }
  0x5e   : > { %v2143_v18 = vmul.f32 %v1778_v17, %v480_v3  ;;  %v2145_v19 = vmul.f32 %v1778_v17, %v479_v2  ;;  %v2153_v20 = vmul.f32 %v1778_v17, %v478_v1  ;;  %v2159_v21 = vmul.f32 %v1778_v17, %v477_v0 }
  0x60   : > { %1648 = vmatprep.subr.msk.mxu0 %vm485_vm0, %v2143_v18 }
  0x61   : > { %1649 = vmatpush3.xpose.msk.msra.mxu0 %vm485_vm0, %v2143_v18 }
  0x62   : > { %1650 = vmatprep.subr.msk.mxu0 %vm485_vm0, %v2145_v19 }
  0x65   : > { %1651 = vmatpush3.xpose.msk.msra.mxu0 %vm485_vm0, %v2145_v19 }
  0x66   : > { %1652 = vmatprep.subr.msk.mxu0 %vm485_vm0, %v2153_v20 }
  0x69   : > { %1653 = vmatpush3.xpose.msk.msra.mxu0 %vm485_vm0, %v2153_v20 }
  0x6a   : > { %1654 = vmatprep.subr.msk.mxu0 %vm485_vm0, %v2159_v21 }
  0x6d   : > { %1655 = vmatpush3.xpose.msk.msra.mxu0 %vm485_vm0, %v2159_v21 }
  0x6e   : > { %1681 = vmatprep.subr.mxu0 %v2143_v18 }
  0x70   : > { %1657 = vmatmul.mubr.msk.f32.vlgmr.msra.gmra.mxu0 %vm485_vm0, %v2167_v22 }
  0x71   : > { %1682 = vmatpush3.msra.mxu0 %v2143_v18 }
  0x72   : > { %1683 = vmatprep.subr.mxu0 %v2145_v19 }
  0x73   : > { %1684 = vmatpush3.msra.mxu0 %v2145_v19 }
  0x74   : > { %1685 = vmatprep.subr.mxu0 %v2153_v20 }
  0x75   : > { %1686 = vmatpush3.msra.mxu0 %v2153_v20 }
  0x76   : > { %1687 = vmatprep.subr.mxu0 %v2159_v21 }
  0x77   : > { %1688 = vmatpush3.msra.mxu0 %v2159_v21 }
 0x130   : > { %v2179_v23 = vpop.f32.mrf.mxu0 }
 0x131   : > { %v2185_v25 = vsel %vm595_vm1, %v2179_v23, -inf }
 0x132   : > { %v2181_v24 = vpop.f32.mrf.mxu0 }
 0x133   : > { %v2189_v26 = vsel %vm485_vm0, %v2181_v24, -inf }
 0x134   : > { %v597_v27 = vmax.f32 %v2189_v26, %v2185_v25 }
 0x136   : > { %v598_v28 = vrot.slane %v597_v27, 4 }
 0x138   : > { %v599_v30 = vmax.f32 %v597_v27, %v598_v28 }
 0x13a   : > { %v600_v31 = vrot.slane %v599_v30, 2 }
 0x13c   : > { %v601_v33 = vmax.f32 %v599_v30, %v600_v31 }
 0x13e   : > { %v602_v34 = vrot.slane %v601_v33, 1 }
 0x140   : > { %v603_v36 = vmax.f32 %v601_v33, %v602_v34 }
 0x142   : > { %v604_v37 = vsub.f32 %v2181_v24, %v603_v36  ;;  %v605_v38 = vsub.f32 %v2179_v23, %v603_v36  ;;  %vm644_vm2 = vcmp.eq.f32.partialorder %v2181_v24, %v603_v36  ;;  %vm645_vm3 = vcmp.eq.f32.partialorder %v2179_v23, %v603_v36 }
 0x143   : > { %v646_v39 = vsel %vm644_vm2, %v2193_v32, 10  ;;  %v647_v40 = vsel %vm645_vm3, %v2196_v35, 10 }
 0x144   : > { %v606_v41 = vmul.f32 1.442695, %v604_v37  ;;  %v608_v42 = vmul.f32 1.442695, %v605_v38  ;;  %v648_v43 = vsel %vm485_vm0, %v646_v39, 2147483647 }
 0x145   : > { %v649_v44 = vsel %vm595_vm1, %v647_v40, 2147483647 }
 0x146   : > { %1779 = vpow2.f32 %v606_v41  ;;  %vm650_vm4 = vcmp.lt.s32.totalorder %v648_v43, %v649_v44 }
 0x147   : > { %1781 = vpow2.f32 %v608_v42  ;;  %v651_v45 = vsel %vm650_vm4, %v648_v43, %v649_v44  ;;  %vm719_vm4 = vcmask 523264  }
 0x148   : > { %v652_v46 = vrot.slane %v651_v45, 4 }
 0x14a   : > { %vm653_vm5 = vcmp.lt.s32.totalorder %v651_v45, %v652_v46 }
 0x14b   : > { %v654_v47 = vsel %vm653_vm5, %v651_v45, %v652_v46  ;;  %vm791_vm5 = vcmask 1041408  }
 0x14c   : > { %v655_v48 = vrot.slane %v654_v47, 2  ;;  %1659 = vmatprep.subr.msk.mxu1 %vm791_vm5, %v2167_v22 }
 0x14d   : > { %1660 = vmatpush3.msk.msra.mxu1 %vm791_vm5, %v2167_v22 }
 0x14e   : > { %vm656_vm6 = vcmp.lt.s32.totalorder %v654_v47, %v655_v48  ;;  %1661 = vmatprep.subr.mxu1 %v2135_v7 }
 0x14f   : > { %v657_v49 = vsel %vm656_vm6, %v654_v47, %v655_v48  ;;  %1662 = vmatpush3.msra.mxu1 %v2135_v7  ;;  %vm754_vm6 = vcmask 80896  }
 0x150   : > { %v658_v50 = vrot.slane %v657_v49, 1 }
 0x152   : > { %vm659_vm7 = vcmp.lt.s32.totalorder %v657_v49, %v658_v50 }
 0x153   : > { %v2206_v51 = vpop.eup %1779  ;;  %v660_v52 = vsel %vm659_vm7, %v657_v49, %v658_v50 }
 0x154   : > { %v2208_v53 = vpop.eup %1781  ;;  %vm661_vm8 = vcmp.eq.s32.totalorder %v2193_v32, %v660_v52  ;;  %vm662_vm9 = vcmp.eq.s32.totalorder %v2196_v35, %v660_v52  ;;  %v610_v54 = vsel %vm485_vm0, %v2206_v51, 0.0 }
 0x155   : > { %v664_v55 = vsel %vm662_vm9, -inf, %v2179_v23  ;;  %v2215_v57 = vsel %vm661_vm8, 1.0, %v1949_v56  ;;  %v2217_v58 = vsel %vm662_vm9, 1.0, %v1949_v56  ;;  %v663_v59 = vsel %vm661_vm8, -inf, %v2181_v24 }
 0x156   : > { %v666_v60 = vsel %vm595_vm1, %v664_v55, -inf  ;;  %v1772_v61 = vpack.i.bf16 %v2217_v58, %v2215_v57  ;;  %v665_v62 = vsel %vm485_vm0, %v663_v59, -inf  ;;  %v611_v63 = vsel %vm595_vm1, %v2208_v53, 0.0 }
 0x157   : > { %v667_v0 = vmax.f32 %v665_v62, %v666_v60  ;;  %v612_v1 = vadd.f32 %v611_v63, %v610_v54 }
 0x158   : > { %1773 = vrot.lane.b32.xlu0 %v1772_v61, %s1950_s27 }
 0x159   : > { %v668_v2 = vrot.slane %v667_v0, 4  ;;  %v613_v3 = vrot.slane %v612_v1, 4 }
 0x15b   : > { %v669_v4 = vmax.f32 %v667_v0, %v668_v2  ;;  %v614_v5 = vadd.f32 %v613_v3, %v612_v1 }
 0x15d   : > { %v670_v6 = vrot.slane %v669_v4, 2  ;;  %v615_v8 = vrot.slane %v614_v5, 2 }
 0x15f   : > { %v671_v9 = vmax.f32 %v669_v4, %v670_v6  ;;  %v616_v10 = vadd.f32 %v615_v8, %v614_v5 }
 0x161   : > { %v672_v11 = vrot.slane %v671_v9, 1  ;;  %v617_v12 = vrot.slane %v616_v10, 1 }
 0x163   : > { %v673_v13 = vmax.f32 %v671_v9, %v672_v11  ;;  %v618_v14 = vadd.f32 %v617_v12, %v616_v10 }
 0x165   : > { %vm674_vm10 = vcmp.eq.f32.partialorder %v663_v59, %v673_v13  ;;  %vm675_vm11 = vcmp.eq.f32.partialorder %v664_v55, %v673_v13  ;;  %1783 = vrcp.f32 %v618_v14 }
 0x166   : > { %v676_v15 = vsel %vm674_vm10, %v2193_v32, 10  ;;  %v677_v16 = vsel %vm675_vm11, %v2196_v35, 10 }
 0x167   : > { %v678_v17 = vsel %vm485_vm0, %v676_v15, 2147483647  ;;  %v679_v27 = vsel %vm595_vm1, %v677_v16, 2147483647 }
 0x168   : > { %vm680_vm12 = vcmp.lt.s32.totalorder %v678_v17, %v679_v27 }
 0x169   : > { %v681_v28 = vsel %vm680_vm12, %v678_v17, %v679_v27 }
 0x16a   : > { %v682_v29 = vrot.slane %v681_v28, 4 }
 0x16c   : > { %vm683_vm13 = vcmp.lt.s32.totalorder %v681_v28, %v682_v29 }
 0x16d   : > { %v684_v30 = vsel %vm683_vm13, %v681_v28, %v682_v29 }
 0x16e   : > { %v685_v31 = vrot.slane %v684_v30, 2 }
 0x170   : > { %vm686_vm14 = vcmp.lt.s32.totalorder %v684_v30, %v685_v31 }
 0x171   : > { %v687_v33 = vsel %vm686_vm14, %v684_v30, %v685_v31 }
 0x172   : > { %v1784_v34 = vpop.eup %1783  ;;  %v688_v36 = vrot.slane %v687_v33, 1 }
 0x173   : > { %v620_v37 = vmul.f32 %v1784_v34, %v618_v14 }
 0x174   : > { %vm689_vm15 = vcmp.lt.s32.totalorder %v687_v33, %v688_v36 }
 0x175   : > { %v690_v38 = vsel %vm689_vm15, %v687_v33, %v688_v36  ;;  %v621_v39 = vsub.f32 2.0, %v620_v37 }
 0x176   : > { %vm696_vm2 = vcmp.eq.s32.totalorder %v2196_v35, %v690_v38  ;;  %vm695_vm3 = vcmp.eq.s32.totalorder %v2193_v32, %v690_v38 }
 0x177   : > { %v1595_v40 = vsel %vm696_vm2, 1.0, %v1949_v56  ;;  %v1594_v41 = vsel %vm695_vm3, 1.0, %v1949_v56  ;;  %v622_v42 = vmul.f32 %v1784_v34, %v621_v39 }
 0x178   : > { %713 = vrot.lane.b32.xlu1 %v1595_v40, %s1951_s17  ;;  %711 = vrot.lane.b32.xlu0 %v1594_v41, %s1951_s17 }
 0x179   : > { %v623_v43 = vmul.f32 %v2206_v51, %v622_v42  ;;  %v624_v44 = vmul.f32 %v2208_v53, %v622_v42 }
 0x17b   : > { %1158 = vst.msk [vmem:[%s446_s26] sm:$0xff] %vm485_vm0, %v623_v43 }
 0x17c   : > { %1159 = vst.msk [vmem:[%s446_s26 + $0x8] sm:$0x3] %vm595_vm1, %v624_v44  ;;  %s1859_s26 = scalar_lea.vmem %s2336_s12, 512 }
 0x17d   : > { %p1860_p8 = scmp.ne.s32.totalorder %s2336_s12, %s1859_s26 }
 0x17f   : > { %p1861_p12 = pnand %p1860_p8, %p2090_p13 }
 0x181   : > { %p1862_p0 = pneg %p1861_p12 }
 0x197   : > { %625 = vmax.xlane.f32.xlu0 %v2189_v26 }
 0x19b   : > { %627 = vmax.xlane.f32.xlu0 %v2185_v25 }
 0x1ca   : > { %v1774_v32 = vpop.permute.xlu0 %1773 }
 0x1cb   : > { %v1775_v35 = vunpack.i.l.bf16 %v1774_v32  ;;  %v1776_v45 = vunpack.i.h.bf16 %v1774_v32 }
 0x1cd   : > { %v717_v47 = vsel %vm485_vm0, %v623_v43, %v1775_v35  ;;  %v718_v25 = vsel %vm485_vm0, %v624_v44, %v1776_v45 }
 0x1ea   : > { %v712_v46 = vpop.permute.xlu0 %711  ;;  %v714_v49 = vpop.permute.xlu1 %713 }
 0x1eb   : > { %v720_v48 = vsel %vm719_vm4, %v717_v47, %v712_v46  ;;  %v721_v26 = vsel %vm719_vm4, %v718_v25, %v714_v49 }
 0x1ec   : > { %722 = vxpose.xlu1.b32.start [1/2] (short) (narrow) %v720_v48, 96 }
 0x1f0   : > { %723 = vxpose.xlu1.b32.end [2/2] (short) (narrow) %v721_v26, 96 }
 0x220   : > { %v2255_v50 = vpop.xlane.xlu0 %625 }
 0x221   : > { %v629_v51 = vsub.f32 %v2181_v24, %v2255_v50 }
 0x223   : > { %v631_v52 = vmul.f32 1.442695, %v629_v51 }
 0x224   : > { %v2259_v53 = vpop.xlane.xlu0 %627 }
 0x225   : > { %1785 = vpow2.f32 %v631_v52  ;;  %v630_v22 = vsub.f32 %v2179_v23, %v2259_v53 }
 0x227   : > { %v633_v54 = vmul.f32 1.442695, %v630_v22 }
 0x229   : > { %1787 = vpow2.f32 %v633_v54 }
 0x232   : > { %v2267_v7 = vpop.eup %1785 }
 0x233   : > { %v1069_v55 = vmul.f32 %v2267_v7, %v2215_v57  ;;  %1156 = vst.msk [vmem:[%s437_s11] sm:$0xff] %vm485_vm0, %v2267_v7 }
 0x235   : > { %1689 = vmatprep.mubr.msk.f32.mxu0 %vm485_vm0, %v1069_v55 }
 0x236   : > { %v2274_v24 = vpop.eup %1787 }
 0x237   : > { %v1070_v23 = vmul.f32 %v2274_v24, %v2217_v58  ;;  %1157 = vst.msk [vmem:[%s437_s11 + $0x8] sm:$0x3] %vm595_vm1, %v2274_v24  ;;  %s1865_s11 = scalar_lea.vmem %s1864_s20, 1024 }
 0x238   : > { %p1867_p3 = scmp.lt.s32.totalorder %s1865_s11, %s1859_s26 }
 0x239   : > { %1690 = vmatmul.mubr.msk.f32.vlgmr.msra.gmra.mxu0 %vm485_vm0, %v1070_v23 }
 0x23a   : > { %p1868_p5 = por %p1867_p3, %p1866_p2 }
 0x23c   : > { %p1869_p7 = pnand %p1868_p5, %p1862_p0 }
 0x268   : > { %v738_v56 = vpop.trf.xlu1 }
 0x269   : > { %1663 = vmatprep.mubr.msk.f32.mxu1 %vm754_vm6, %v738_v56 }
 0x26c   : > { %v739_v57 = vpop.trf.xlu1 }
 0x26d   : > { %1664 = vmatmul.mubr.msk.f32.vlgmr.msra.gmra.mxu1 %vm754_vm6, %v739_v57 }
 0x270   : > { %v740_v59 = vpop.trf.xlu1 }
 0x271   : > { %1666 = vmatprep.mubr.msk.f32.mxu1 %vm754_vm6, %v740_v59 }
 0x274   : > { %v741_v60 = vpop.trf.xlu1 }
 0x275   : > { %1667 = vmatmul.mubr.msk.f32.gmra.mxu1 %vm754_vm6, %v741_v60 }
 0x278   : > { %v742_v61 = vpop.trf.xlu1 }
 0x279   : > { %1669 = vmatprep.mubr.msk.f32.mxu1 %vm754_vm6, %v742_v61 }
 0x27c   : > { %v743_v58 = vpop.trf.xlu1 }
 0x27d   : > { %1670 = vmatmul.mubr.msk.f32.gmra.mxu1 %vm754_vm6, %v743_v58 }
 0x280   : > { %v744_v62 = vpop.trf.xlu1 }
 0x281   : > { %1672 = vmatprep.mubr.msk.f32.mxu1 %vm754_vm6, %v744_v62  ;;  %v635_v62 = vsel %vm485_vm0, %v2267_v7, 0.0 }
 0x284   : > { %v745_v63 = vpop.trf.xlu1 }
 0x285   : > { %1673 = vmatmul.mubr.msk.f32.gmra.mxu1 %vm754_vm6, %v745_v63  ;;  %v638_v63 = vsel %vm595_vm1, %v2274_v24, 0.0 }
 0x288   : > { %v746_v0 = vpop.trf.xlu1 }
 0x289   : > { %1675 = vmatprep.mubr.msk.f32.mxu1 %vm754_vm6, %v746_v0 }
 0x28c   : > { %v747_v1 = vpop.trf.xlu1 }
 0x28d   : > { %1676 = vmatmul.mubr.msk.f32.gmra.mxu1 %vm754_vm6, %v747_v1 }
 0x290   : > { %v748_v2 = vpop.trf.xlu1 }
 0x291   : > { %1678 = vmatprep.mubr.msk.f32.mxu1 %vm754_vm6, %v748_v2 }
 0x294   : > { %v749_v3 = vpop.trf.xlu1 }
 0x295   : > { %1679 = vmatmul.mubr.msk.f32.gmra.mxu1 %vm754_vm6, %v749_v3 }
 0x2f9   : > { %v1691_v4 = vpop.f32.mrf.mxu0 }
 0x2fa   : > { %1168 = vst.msk [vmem:[%s464_s24 + $0x8] sm:$0x3] %vm595_vm1, %v1691_v4 }
 0x2fb   : > { %v1143_v5 = vpop.f32.mrf.mxu0 }
 0x2fc   : > { %1167 = vst.msk [vmem:[%s464_s24] sm:$0xff] %vm485_vm0, %v1143_v5 }
 0x32d   : > { %v1665_v6 = vpop.f32.mrf.mxu1 }
 0x32e   : > { %1153 = vst.msk [vmem:[%s2301_s19 + $0x8] sm:$0xff] %vm485_vm0, %v1665_v6 }
 0x32f   : > { %v860_v8 = vpop.f32.mrf.mxu1 }
 0x330   : > { %1152 = vst.msk [vmem:[%s2301_s19] sm:$0xff] %vm485_vm0, %v860_v8 }
 0x335   : > { %v1668_v9 = vpop.f32.mrf.mxu1 }
 0x336   : > { %1155 = vst.msk [vmem:[%s2301_s19 + $0x18] sm:$0xff] %vm485_vm0, %v1668_v9 }
 0x337   : > { %v870_v10 = vpop.f32.mrf.mxu1 }
 0x338   : > { %1154 = vst.msk [vmem:[%s2301_s19 + $0x10] sm:$0xff] %vm485_vm0, %v870_v10 }
 0x33d   : > { %v1671_v11 = vpop.f32.mrf.mxu1 }
 0x33e   : > { %v920_v12 = vsub.f32 %v2153_v20, %v1671_v11 }
 0x33f   : > { %v880_v13 = vpop.f32.mrf.mxu1 }
 0x340   : > { %v949_v14 = vadd.f32 1e-06, %v920_v12  ;;  %v919_v15 = vsub.f32 %v2159_v21, %v880_v13 }
 0x342   : > { %v948_v16 = vadd.f32 1e-06, %v919_v15  ;;  %v961_v17 = vmul.f32 %v949_v14, %v949_v14  ;;  %v923_v56 = vmul.f32 %v919_v15, %v919_v15 }
 0x344   : > { %v967_v27 = vsel %vm485_vm0, %v961_v17, 0.0  ;;  %v960_v28 = vmul.f32 %v948_v16, %v948_v16 }
 0x345   : > { %968 = vadd.xlane.f32.xlu0 %v967_v27  ;;  %v1674_v29 = vpop.f32.mrf.mxu1 }
 0x346   : > { %v964_v30 = vsel %vm485_vm0, %v960_v28, 0.0  ;;  %v922_v38 = vsub.f32 %v2143_v18, %v1674_v29 }
 0x347   : > { %v890_v31 = vpop.f32.mrf.mxu1 }
 0x348   : > { %v921_v33 = vsub.f32 %v2145_v19, %v890_v31  ;;  %v951_v44 = vadd.f32 1e-06, %v922_v38  ;;  %v926_v61 = vmul.f32 %v922_v38, %v922_v38 }
 0x349   : > { %965 = vadd.xlane.f32.xlu0 %v964_v30 }
 0x34a   : > { %v950_v39 = vadd.f32 1e-06, %v921_v33  ;;  %v925_v59 = vmul.f32 %v921_v33, %v921_v33  ;;  %v936_v58 = vsel %vm485_vm0, %v926_v61, 0.0 }
 0x34c   : > { %v962_v45 = vmul.f32 %v950_v39, %v950_v39  ;;  %v933_v60 = vsel %vm485_vm0, %v925_v59, 0.0 }
 0x34d   : > { %v1677_v34 = vpop.f32.mrf.mxu1 }
 0x34e   : > { %v953_v36 = vsub.f32 %v2153_v20, %v1677_v34  ;;  %v970_v25 = vsel %vm485_vm0, %v962_v45, 0.0 }
 0x34f   : > { %v900_v37 = vpop.f32.mrf.mxu1 }
 0x350   : > { %v957_v40 = vadd.f32 1e-06, %v953_v36  ;;  %v952_v41 = vsub.f32 %v2159_v21, %v900_v37  ;;  %v963_v21 = vmul.f32 %v951_v44, %v951_v44 }
 0x352   : > { %v1005_v42 = vmul.f32 %v957_v40, %v957_v40  ;;  %v956_v43 = vadd.f32 1e-06, %v952_v41  ;;  %v973_v22 = vsel %vm485_vm0, %v963_v21, 0.0 }
 0x354   : > { %v1004_v32 = vmul.f32 %v956_v43, %v956_v43  ;;  %v1011_v35 = vsel %vm485_vm0, %v1005_v42, 0.0 }
 0x355   : > { %1012 = vadd.xlane.f32.xlu0 %v1011_v35  ;;  %v1680_v46 = vpop.f32.mrf.mxu1 }
 0x356   : > { %v1008_v47 = vsel %vm485_vm0, %v1004_v32, 0.0  ;;  %v955_v48 = vsub.f32 %v2143_v18, %v1680_v46  ;;  %v927_v18 = vsel %vm485_vm0, %v923_v56, 0.0 }
 0x357   : > { %1009 = vadd.xlane.f32.xlu1 %v1008_v47  ;;  %v910_v20 = vpop.f32.mrf.mxu1 }
 0x358   : > { %v954_v49 = vsub.f32 %v2145_v19, %v910_v20  ;;  %v959_v51 = vadd.f32 1e-06, %v955_v48  ;;  %v924_v19 = vmul.f32 %v920_v12, %v920_v12 }
 0x359   : > { %971 = vadd.xlane.f32.xlu0 %v970_v25 }
 0x35a   : > { %v958_v26 = vadd.f32 1e-06, %v954_v49  ;;  %v1007_v54 = vmul.f32 %v959_v51, %v959_v51  ;;  %v930_v57 = vsel %vm485_vm0, %v924_v19, 0.0 }
 0x35c   : > { %v1006_v52 = vmul.f32 %v958_v26, %v958_v26  ;;  %v1017_v23 = vsel %vm485_vm0, %v1007_v54, 0.0 }
 0x35d   : > { %974 = vadd.xlane.f32.xlu0 %v973_v22 }
 0x35e   : > { %v1014_v55 = vsel %vm485_vm0, %v1006_v52, 0.0 }
 0x361   : > { %1015 = vadd.xlane.f32.xlu0 %v1014_v55 }
 0x365   : > { %1018 = vadd.xlane.f32.xlu0 %v1017_v23 }
 0x369   : > { %928 = vadd.xlane.f32.xlu0 %v927_v18 }
 0x36d   : > { %931 = vadd.xlane.f32.xlu0 %v930_v57 }
 0x371   : > { %934 = vadd.xlane.f32.xlu0 %v933_v60 }
 0x375   : > { %937 = vadd.xlane.f32.xlu0 %v936_v58 }
 0x379   : > { %636 = vadd.xlane.f32.xlu0 %v635_v62 }
 0x37d   : > { %639 = vadd.xlane.f32.xlu0 %v638_v63 }
 0x37e   : > { %1872 = shalt.err (!%p1869_p7)
}
 0x37f   : > { %s1873_s30 = scalar_lea.hbm %s2342_s21, 512  ;;  %s1877_s24 = scalar_lea.hbm %s2424_s2, 1024 }
 0x380   : > { %p1874_p4 = scmp.ne.s32.totalorder %s2342_s21, %s1873_s30  ;;  %p1878_p11 = scmp.lt.s32.totalorder %s2342_s21, %s2424_s2 }
 0x381   : > { %p1879_p10 = scmp.lt.s32.totalorder %s1877_s24, %s1873_s30 }
 0x382   : > { %p1875_p6 = pnand %p1874_p4, %p2090_p13 }
 0x383   : > { %p1880_p1 = por %p1879_p10, %p1878_p11 }
 0x384   : > { %p1876_p9 = pneg %p1875_p6 }
 0x386   : > { %p1881_p8 = pnand %p1880_p1, %p1876_p9 }
 0x388   : > { %1884 = shalt.err (!%p1881_p8)
}
 0x389   : > { %s1953_s27 = smov 128   ;;  %s1954_s17 = smov 8  }
 0x38a   : > { %1698 = dma.vmem_to_hbm [thread:$0]  (%p2090_p13), %s2336_s12, 512, %s2342_s21, %s1173_s22, %s1953_s27, %s1953_s27, %s1954_s17  }
 0x38b   : > { %s455_s12 = scalar_lea.vmem %s2427_s5, %s2235_s15  ;;  %s470_s22 = scalar_lea.vmem %s2429_s7, %s2232_s13 }
 0x38c   : > { %s476_s20 = scalar_lea.vmem %s2430_s8, %s2232_s13 }
 0x3ce   : > { %v969_v7 = vpop.xlane.xlu0 %968 }
 0x3cf   : > { %vm985_vm8 = vcmp.eq.f32.partialorder %v969_v7, inf  ;;  %v988_v36 = vand.u32 2147483648, %v969_v7  ;;  %vm987_vm12 = vcmp.eq.f32.partialorder %v969_v7, 0.0 }
 0x3d2   : > { %v966_v24 = vpop.xlane.xlu0 %965 }
 0x3d3   : > { %1789 = vrsqrt.f32 %v966_v24  ;;  %vm978_vm7 = vcmp.eq.f32.partialorder %v966_v24, inf  ;;  %v981_v33 = vand.u32 2147483648, %v966_v24  ;;  %vm980_vm11 = vcmp.eq.f32.partialorder %v966_v24, 0.0 }
 0x3de   : > { %v1013_v0 = vpop.xlane.xlu0 %1012 }
 0x3df   : > { %1791 = vrsqrt.f32 %v1013_v0  ;;  %vm1029_vm1 = vcmp.eq.f32.partialorder %v1013_v0, inf  ;;  %v1032_v30 = vand.u32 2147483648, %v1013_v0  ;;  %vm1031_vm10 = vcmp.eq.f32.partialorder %v1013_v0, 0.0 }
 0x3e0   : > { %1793 = vrsqrt.f32 %v969_v7  ;;  %v1010_v1 = vpop.xlane.xlu1 %1009  ;;  %v1790_v5 = vpop.eup %1789 }
 0x3e1   : > { %1795 = vrsqrt.f32 %v1010_v1  ;;  %v977_v12 = vmul.f32 %v1790_v5, %v966_v24  ;;  %vm1022_vm0 = vcmp.eq.f32.partialorder %v1010_v1, inf  ;;  %v1025_v27 = vand.u32 2147483648, %v1010_v1 }
 0x3e2   : > { %v972_v2 = vpop.xlane.xlu0 %971  ;;  %vm1024_vm9 = vcmp.eq.f32.partialorder %v1010_v1, 0.0 }
 0x3e3   : > { %1797 = vrsqrt.f32 %v972_v2  ;;  %v979_v29 = vsel %vm978_vm7, %v966_v24, %v977_v12  ;;  %vm992_vm13 = vcmp.eq.f32.partialorder %v972_v2, inf  ;;  %vm994_vm14 = vcmp.eq.f32.partialorder %v972_v2, 0.0 }
 0x3e4   : > { %v982_v40 = vsel %vm980_vm11, %v981_v33, %v979_v29  ;;  %v995_v47 = vand.u32 2147483648, %v972_v2  ;;  %vm1165_vm7 = vcmask 9216  }
 0x3e6   : > { %v2367_v3 = vpop.xlane.xlu0 %974 }
 0x3e7   : > { %1799 = vrsqrt.f32 %v2367_v3  ;;  %vm999_vm15 = vcmp.eq.f32.partialorder %v2367_v3, inf  ;;  %vm1001_vm4 = vcmp.eq.f32.partialorder %v2367_v3, 0.0  ;;  %v1002_v18 = vand.u32 2147483648, %v2367_v3 }
 0x3ea   : > { %v1016_v4 = vpop.xlane.xlu0 %1015 }
 0x3eb   : > { %1801 = vrsqrt.f32 %v1016_v4  ;;  %vm1036_vm2 = vcmp.eq.f32.partialorder %v1016_v4, inf  ;;  %v1039_v20 = vand.u32 2147483648, %v1016_v4  ;;  %vm1038_vm3 = vcmp.eq.f32.partialorder %v1016_v4, 0.0 }
 0x3ec   : > { %v1792_v6 = vpop.eup %1791 }
 0x3ed   : > { %v1794_v8 = vpop.eup %1793  ;;  %v1028_v10 = vmul.f32 %v1792_v6, %v1013_v0 }
 0x3ee   : > { %v1796_v9 = vpop.eup %1795  ;;  %v2370_v11 = vpop.xlane.xlu0 %1018  ;;  %v984_v14 = vmul.f32 %v1794_v8, %v969_v7 }
 0x3ef   : > { %v1021_v13 = vmul.f32 %v1796_v9, %v1010_v1  ;;  %1803 = vrsqrt.f32 %v2370_v11  ;;  %v1030_v17 = vsel %vm1029_vm1, %v1013_v0, %v1028_v10  ;;  %vm1043_vm5 = vcmp.eq.f32.partialorder %v2370_v11, inf }
 0x3f0   : > { %v1798_v16 = vpop.eup %1797  ;;  %v986_v31 = vsel %vm985_vm8, %v969_v7, %v984_v14  ;;  %v1033_v37 = vsel %vm1031_vm10, %v1032_v30, %v1030_v17  ;;  %vm1045_vm6 = vcmp.eq.f32.partialorder %v2370_v11, 0.0  ;;  %v1046_v19 = vand.u32 2147483648, %v2370_v11 }
 0x3f1   : > { %v1023_v15 = vsel %vm1022_vm0, %v1010_v1, %v1021_v13  ;;  %v991_v38 = vmul.f32 %v1798_v16, %v972_v2  ;;  %v989_v42 = vsel %vm987_vm12, %v988_v36, %v986_v31  ;;  %vm1160_vm0 = vcmask 7168  }
 0x3f2   : > { %v929_v28 = vpop.xlane.xlu0 %928  ;;  %v1026_v34 = vsel %vm1024_vm9, %v1025_v27, %v1023_v15  ;;  %v1049_v32 = vsub.f32 %v989_v42, %v1033_v37  ;;  %vm1163_vm1 = vcmask 15360   ;;  %vm1169_vm8 = vcmask 0  }
 0x3f3   : > { %v1048_v43 = vsub.f32 %v982_v40, %v1026_v34  ;;  %v993_v35 = vsel %vm992_vm13, %v972_v2, %v991_v38 }
 0x3f4   : > { %v1800_v39 = vpop.eup %1799  ;;  %v1053_v51 = vadd.f32 1.0, %v1049_v32  ;;  %v996_v52 = vsel %vm994_vm14, %v995_v47, %v993_v35 }
 0x3f5   : > { %v998_v45 = vmul.f32 %v1800_v39, %v2367_v3  ;;  %v1052_v49 = vadd.f32 1.0, %v1048_v43 }
 0x3f6   : > { %v932_v41 = vpop.xlane.xlu0 %931  ;;  %v1057_v7 = vmax.f32 %v1053_v51, 0.0 }
 0x3f7   : > { %v939_v21 = vadd.f32 %v932_v41, %v929_v28  ;;  %v1000_v54 = vsel %vm999_vm15, %v2367_v3, %v998_v45  ;;  %v1056_v59 = vmax.f32 %v1052_v49, 0.0 }
 0x3f8   : > { %v1802_v44 = vpop.eup %1801  ;;  %v1003_v62 = vsel %vm1001_vm4, %v1002_v18, %v1000_v54 }
 0x3f9   : > { %v1035_v46 = vmul.f32 %v1802_v44, %v1016_v4  ;;  %v1060_v3 = vadd.f32 %v1057_v7, %v1056_v59 }
 0x3fa   : > { %v935_v48 = vpop.xlane.xlu0 %934 }
 0x3fb   : > { %v1037_v25 = vsel %vm1036_vm2, %v1016_v4, %v1035_v46  ;;  %v940_v56 = vadd.f32 %v939_v21, %v935_v48 }
 0x3fc   : > { %v1804_v26 = vpop.eup %1803  ;;  %v1040_v22 = vsel %vm1038_vm3, %v1039_v20, %v1037_v25 }
 0x3fd   : > { %v1050_v55 = vsub.f32 %v996_v52, %v1040_v22  ;;  %v1042_v23 = vmul.f32 %v1804_v26, %v2370_v11 }
 0x3fe   : > { %v938_v57 = vpop.xlane.xlu0 %937 }
 0x3ff   : > { %v1054_v60 = vadd.f32 1.0, %v1050_v55  ;;  %v1044_v61 = vsel %vm1043_vm5, %v2370_v11, %v1042_v23  ;;  %v941_v58 = vadd.f32 %v940_v56, %v938_v57 }
 0x400   : > { %v1047_v63 = vsel %vm1045_vm6, %v1046_v19, %v1044_v61 }
 0x401   : > { %v1058_v24 = vmax.f32 %v1054_v60, 0.0  ;;  %v1051_v0 = vsub.f32 %v1003_v62, %v1047_v63  ;;  %v942_v1 = vrot.slane %v941_v58, 4 }
 0x402   : > { %v637_v2 = vpop.xlane.xlu0 %636 }
 0x403   : > { %v1055_v4 = vadd.f32 1.0, %v1051_v0  ;;  %v943_v5 = vadd.f32 %v942_v1, %v941_v58  ;;  %v1161_v6 = vsel %vm1160_vm0, %v2255_v50, %v637_v2  ;;  %v1061_v8 = vadd.f32 %v1060_v3, %v1058_v24 }
 0x404   : > { %1164 = vst.msk [vmem:[%s455_s12] sm:$0xff] %vm1163_vm1, %v1161_v6 }
 0x405   : > { %v1059_v9 = vmax.f32 %v1055_v4, 0.0  ;;  %v944_v10 = vrot.slane %v943_v5, 2 }
 0x406   : > { %v640_v11 = vpop.xlane.xlu0 %639 }
 0x407   : > { %v1062_v12 = vadd.f32 %v1061_v8, %v1059_v9  ;;  %v945_v13 = vadd.f32 %v944_v10, %v943_v5  ;;  %v1162_v14 = vsel %vm1160_vm0, %v2259_v53, %v640_v11 }
 0x408   : > { %1166 = vst.msk [vmem:[%s455_s12 + $0x8] sm:$0x3] %vm1165_vm7, %v1162_v14 }
 0x409   : > { %v1063_v15 = vrot.slane %v1062_v12, 4  ;;  %v946_v16 = vrot.slane %v945_v13, 1 }
 0x40b   : > { %v1064_v50 = vadd.f32 %v1063_v15, %v1062_v12  ;;  %v947_v17 = vadd.f32 %v946_v16, %v945_v13 }
 0x40d   : > { %v1065_v27 = vrot.slane %v1064_v50, 2  ;;  %1170 = vst.msk [vmem:[%s470_s22] sm:$0x1] %vm1169_vm8, %v947_v17 }
 0x40f   : > { %v1066_v28 = vadd.f32 %v1065_v27, %v1064_v50 }
 0x411   : > { %v1067_v29 = vrot.slane %v1066_v28, 1 }
 0x413   : > { %v1068_v30 = vadd.f32 %v1067_v29, %v1066_v28 }
 0x415   : > { %1171 = vst.msk [vmem:[%s476_s20] sm:$0x1] %vm1169_vm8, %v1068_v30 }
 0x416 PF: > { %s2456_s11 = sld [smem:[#allocation11_spill]]  ;;  %p2459_p12 = scmp.ge.s32.totalorder %s1943_s10, 2 }
 0x417   : > { %s2457_s30 = sld [smem:[#allocation13_spill]] }
 0x41c   : > { %s1268_s23 = sand.u32 1, %s2456_s11  }
 0x41d   : > { %p2458_p13 = scmp.ne.s32.totalorder %s2457_s30, 0  ;;  %s1269_s16 = scalar_lea.sflag [#allocation4], %s1268_s23 }
 0x41f   : > { %p1709_p0 = pnand %p2459_p12, %p2458_p13 }
 0x421   : > { %p1710_p2 = pneg %p1709_p0 }
 0x423   : > { %1918 = dma.done.wait (%p1710_p2), %s1269_s16, 512  }
 0x424   : > { %1920 = vsyncadd (%p1710_p2), %s1269_s16, 4294966784  ;;  %s26_s10 = sadd.s32 1, %s1943_s10   ;;  %s2460_s30 = sld [smem:[#allocation12_spill]] }
 0x425   : > { %p23_p3 = scmp.ge.s32.totalorder %s26_s10, 4   ;;  %s2461_s9 = sld [smem:[#allocation14_spill]] }
 0x426   : > { %s2462_s27 = smov %s1927_s28  ;;  %s2463_s28 = smov %s1931_s29 }
 0x427   : > { %s2464_s29 = smov %s2099_s25  ;;  %25 = sbr.rel (!%p23_p3) target bundleno = 9 (0x9), region = 150 }
 0x42c   :  { %1340 = vsyncpa [#allocation3], 1 }
 0x42d   :  { %1342 = vsyncpa [#allocation3 + $0x1], 1 }
 0x42e   :  { %1343 = vsyncpa [#allocation6], 1 }
 0x42f   :  { %1345 = vsyncpa [#allocation6 + $0x1], 1 }
 0x430   :  { %1346 = vsyncpa [#allocation4], 1 }
 0x431   :  { %1348 = vsyncpa [#allocation4 + $0x1], 1 }

</bundles_post_ra>
